<compile_context>
chip_gen: v5e
topology: v5e:2x2
jax: 0.10.0
libtpu: 0.0.40
codegen_flags: <defaults>
</compile_context>

<pallas_src>
import functools

import jax
import jax.numpy as jnp
from jax import lax
from jax.experimental import pallas as pl
from jax.experimental.pallas import tpu as pltpu


def _round_up(a, b):
    return (a + b - 1) // b * b


def _temporal_block_kernel(xl_ref, xc_ref, xr_ref, w_ref, b_ref, o_ref, *,
                           kernel_size, dilation, padding, tl, h_blk, l_in):
    """Grid = (N, n_l_tiles). One (C_out, TL) output tile per step.

    xl_ref: (1, C_in, H)    halo block immediately left of the current tile
    xc_ref: (1, C_in, TL)   current input time tile
    xr_ref: (1, C_in, H)    halo block immediately right of the current tile
    w_ref:  (C_out, K*C_in) conv weight, tap-major along the contraction
    b_ref:  (C_out, 1)      conv bias
    o_ref:  (1, C_out, TL)  ReLU(conv1d(x) + b) output tile
    """
    j = pl.program_id(1)
    base = j * tl                                   # global column of tile start
    xl = xl_ref[0]                                  # (C_in, H)
    xc = xc_ref[0]                                  # (C_in, TL)
    xr = xr_ref[0]                                  # (C_in, H)
    col = lax.broadcasted_iota(jnp.int32, (1, tl), 1)

    taps = []
    for k in range(kernel_size):
        off = k * dilation - padding                # static per-tap offset
        if off == 0:
            xs = xc
        elif off < 0:
            # Left halo columns + head of the current tile.
            xs = jnp.concatenate([xl[:, h_blk + off:], xc[:, :tl + off]],
                                 axis=1)
        else:
            # Tail of the current tile + right halo columns.
            xs = jnp.concatenate([xc[:, off:], xr[:, :off]], axis=1)
        # Zero columns that fall into the conv zero-padding region or past the
        # end of the (possibly partial) last input block.
        g = col + (base + off)
        xs = jnp.where((g >= 0) & (g < l_in), xs, 0.0)
        taps.append(xs)

    # im2col stack -> a single MXU matmul with K*C_in contraction depth.
    rhs = taps[0] if kernel_size == 1 else jnp.concatenate(taps, axis=0)
    acc = jnp.dot(w_ref[...], rhs, preferred_element_type=jnp.float32)
    acc = acc + b_ref[...].astype(jnp.float32)
    acc = jnp.maximum(acc, 0.0)                     # ReLU
    # Dropout: eval/inference mode => identity.
    o_ref[0] = acc.astype(o_ref.dtype)


def temporal_block_forward(x, weight, bias, *, kernel_size, stride=1,
                           dilation=1, time_tile=None):
    """x: (N, C_in, L) f32, weight: (C_out, C_in, K), bias: (C_out,).

    Equivalent to Dropout(ReLU(Conv1d(C_in, C_out, K, stride,
    padding=(K-1)*dilation//2, dilation)(x))) with dropout in eval mode.
    `time_tile` optionally caps the time-tile size (testing/tuning).
    """
    n, c_in, l_in = x.shape
    c_out = weight.shape[0]
    padding = (kernel_size - 1) * dilation // 2

    if stride != 1:
        # TODO(synk): dedicated strided kernel; for now run the stride-1 conv
        # and subsample (correct, but does stride-times extra work).
        l_out_s = (l_in + 2 * padding - dilation * (kernel_size - 1) - 1) // stride + 1
        full = temporal_block_forward(x, weight, bias, kernel_size=kernel_size,
                                      stride=1, dilation=dilation,
                                      time_tile=time_tile)
        return full[:, :, ::stride][:, :, :l_out_s]

    l_out = l_in + 2 * padding - dilation * (kernel_size - 1)

    # Halo geometry: left halo = padding, right halo = (K-1)*d - padding.
    right_halo = (kernel_size - 1) * dilation - padding
    h_blk = _round_up(max(padding, right_halo, 1), 128)

    # Generation-aware VMEM budget (v7x: 64 MiB/TC, v5e/v6e: 128 MiB).
    try:
        vmem_cap = int(getattr(pltpu.get_tpu_info(), "vmem_capacity_bytes",
                               64 * 1024 * 1024))
    except Exception:
        vmem_cap = 64 * 1024 * 1024

    def _step_bytes(t):
        f = 4  # conservative f32 working set
        return (2 * c_in * t * f                     # current tile (dbl-buffered)
                + 4 * c_in * h_blk * f               # two halo blocks (dbl-buf)
                + 2 * c_out * t * f                  # output tile (dbl-buffered)
                + kernel_size * c_in * c_out * f + c_out * f      # params
                + 2 * (kernel_size * c_in + c_out) * t * f)       # rhs + acc

    if time_tile is not None:
        tl_cap = int(time_tile)
    else:
        tl_cap = 2048 if vmem_cap >= (100 << 20) else 1024
    tl = min(tl_cap, _round_up(l_out, 128))
    tl = max(h_blk, _round_up(tl, h_blk))
    budget = int(0.45 * vmem_cap)
    while tl > h_blk and _step_bytes(tl) > budget:
        tl = max(h_blk, _round_up(tl // 2, h_blk))

    n_l_tiles = pl.cdiv(l_out, tl)
    r = tl // h_blk                                  # halo blocks per time tile
    n_h = pl.cdiv(l_in, h_blk)                       # halo blocks along L

    # Tap-major weight: w2[co, k*C_in + ci] = weight[co, ci, k].
    w2 = jnp.transpose(weight, (0, 2, 1)).reshape(c_out, kernel_size * c_in)
    b2 = bias.reshape(c_out, 1)

    kernel = functools.partial(
        _temporal_block_kernel, kernel_size=kernel_size, dilation=dilation,
        padding=padding, tl=tl, h_blk=h_blk, l_in=l_in)

    vmem_limit = int(min(0.8 * vmem_cap,
                         max(32 * 1024 * 1024, 4 * _step_bytes(tl))))

    itemsize = x.dtype.itemsize
    flops = 2 * n * l_out * kernel_size * c_in * c_out
    bytes_accessed = int(n * c_in * l_in * itemsize * (1.0 + 2.0 * h_blk / tl)
                         + (w2.size + b2.size) * itemsize
                         + n * c_out * l_out * itemsize)

    out = pl.pallas_call(
        kernel,
        out_shape=jax.ShapeDtypeStruct((n, c_out, l_out), x.dtype),
        grid_spec=pltpu.PrefetchScalarGridSpec(
            num_scalar_prefetch=0,
            grid=(n, n_l_tiles),
            in_specs=[
                # Left halo: 128-aligned block just before the tile (clamped).
                pl.BlockSpec((1, c_in, h_blk),
                             lambda b, j: (b, 0, jnp.maximum(j * r - 1, 0))),
                # Current time tile.
                pl.BlockSpec((1, c_in, tl), lambda b, j: (b, 0, j)),
                # Right halo: block just after the tile (clamped).
                pl.BlockSpec((1, c_in, h_blk),
                             lambda b, j: (b, 0, jnp.minimum((j + 1) * r,
                                                             n_h - 1))),
                pl.BlockSpec((c_out, kernel_size * c_in), lambda b, j: (0, 0)),
                pl.BlockSpec((c_out, 1), lambda b, j: (0, 0)),
            ],
            out_specs=pl.BlockSpec((1, c_out, tl), lambda b, j: (b, 0, j)),
        ),
        compiler_params=pltpu.CompilerParams(
            dimension_semantics=("parallel", "parallel"),
            vmem_limit_bytes=vmem_limit),
        cost_estimate=pl.CostEstimate(flops=flops, transcendentals=0,
                                      bytes_accessed=bytes_accessed),
    )(x, x, x, w2, b2)

    return out


def _reference_forward(x, weight, bias, *, kernel_size, stride, dilation):
    padding = (kernel_size - 1) * dilation // 2
    out = lax.conv_general_dilated(
        x, weight,
        window_strides=(stride,),
        padding=[(padding, padding)],
        rhs_dilation=(dilation,),
        dimension_numbers=("NCH", "OIH", "NCH"),
    )
    return jnp.maximum(out + bias[None, :, None], 0.0)


if __name__ == "__main__":
    root = jax.random.PRNGKey(0)
    key1, key2 = jax.random.split(root)

    def make_inputs(key, n, c_in, c_out, k, length):
        k_x, k_w, k_b = jax.random.split(key, 3)
        x = jax.random.normal(k_x, (n, c_in, length), dtype=jnp.float32)
        bound = 1.0 / ((c_in * k) ** 0.5)
        w = jax.random.uniform(k_w, (c_out, c_in, k), minval=-bound,
                               maxval=bound, dtype=jnp.float32)
        b = jax.random.uniform(k_b, (c_out,), minval=-bound, maxval=bound,
                               dtype=jnp.float32)
        return x, w, b

    n_inputs, n_outputs, kernel_size = 4, 8, 3

    # Config 1: nominal small shapes (N=2, C_in=4, C_out=8, L=16, d=1, s=1).
    x1, w1, b1 = make_inputs(key1, 2, n_inputs, n_outputs, kernel_size, 16)
    out1 = jax.block_until_ready(
        temporal_block_forward(x1, w1, b1, kernel_size=kernel_size,
                               stride=1, dilation=1))
    ref1 = _reference_forward(x1, w1, b1, kernel_size=kernel_size,
                              stride=1, dilation=1)
    assert out1.shape == ref1.shape, (out1.shape, ref1.shape)
    assert jnp.allclose(out1, ref1, atol=1e-5, rtol=1e-5)

    # Config 2: dilation=2, longer sequence, small forced time tile so that
    # interior tiles (real left/right halo data) and the partial boundary
    # tile / in-kernel padding masks are all exercised.
    x2, w2_, b2_ = make_inputs(key2, 2, n_inputs, n_outputs, kernel_size, 600)
    out2 = jax.block_until_ready(
        temporal_block_forward(x2, w2_, b2_, kernel_size=kernel_size,
                               stride=1, dilation=2, time_tile=256))
    ref2 = _reference_forward(x2, w2_, b2_, kernel_size=kernel_size,
                              stride=1, dilation=2)
    assert out2.shape == ref2.shape, (out2.shape, ref2.shape)
    assert jnp.allclose(out2, ref2, atol=1e-5, rtol=1e-5)

    # Config 3: stride=2 (subsampling fallback path).
    out3 = jax.block_until_ready(
        temporal_block_forward(x1, w1, b1, kernel_size=kernel_size,
                               stride=2, dilation=1))
    ref3 = _reference_forward(x1, w1, b1, kernel_size=kernel_size,
                              stride=2, dilation=1)
    assert out3.shape == ref3.shape, (out3.shape, ref3.shape)
    assert jnp.allclose(out3, ref3, atol=1e-5, rtol=1e-5)

    print("KERNEL_OK")
</pallas_src>

<mosaic_0001>
module attributes {stable_mosaic.version = 11 : i64} {
  func.func @_temporal_block_kernel(%arg0: i32, %arg1: i32, %arg2: memref<1x4x128xf32, #tpu.memory_space<vmem>>, %arg3: memref<1x4x128xf32, #tpu.memory_space<vmem>>, %arg4: memref<1x4x128xf32, #tpu.memory_space<vmem>>, %arg5: memref<8x12xf32, #tpu.memory_space<vmem>>, %arg6: memref<8x1xf32, #tpu.memory_space<vmem>>, %arg7: memref<1x8x128xf32, #tpu.memory_space<vmem>>) attributes {dimension_semantics = [#tpu.dimension_semantics<parallel>, #tpu.dimension_semantics<parallel>], iteration_bounds = array<i64: 2, 1>, scalar_prefetch = 0 : i64, scratch_operands = 0 : i64, tpu.core_type = #tpu.core_type<tc>, window_params = [{transform_indices = @transform_0, window_bounds = array<i64: 1, 4, 128>}, {transform_indices = @transform_1, window_bounds = array<i64: 1, 4, 128>}, {transform_indices = @transform_2, window_bounds = array<i64: 1, 4, 128>}, {pipeline_mode = #tpu.pipeline_mode<synchronous>, transform_indices = @transform_3, window_bounds = array<i64: 8, 12>}, {pipeline_mode = #tpu.pipeline_mode<synchronous>, transform_indices = @transform_4, window_bounds = array<i64: 8, 1>}, {transform_indices = @transform_5, window_bounds = array<i64: 1, 8, 128>}]} {
    %c128_i32 = arith.constant 128 : i32
    %0 = arith.muli %arg1, %c128_i32 : i32
    %c0 = arith.constant 0 : index
    %c0_0 = arith.constant 0 : index
    %c0_1 = arith.constant 0 : index
    %1 = vector.load %arg2[%c0, %c0_0, %c0_1] : memref<1x4x128xf32, #tpu.memory_space<vmem>>, vector<1x4x128xf32>
    %2 = vector.shape_cast %1 : vector<1x4x128xf32> to vector<4x128xf32>
    %c0_2 = arith.constant 0 : index
    %c0_3 = arith.constant 0 : index
    %c0_4 = arith.constant 0 : index
    %3 = vector.load %arg3[%c0_2, %c0_3, %c0_4] : memref<1x4x128xf32, #tpu.memory_space<vmem>>, vector<1x4x128xf32>
    %4 = vector.shape_cast %3 : vector<1x4x128xf32> to vector<4x128xf32>
    %c0_5 = arith.constant 0 : index
    %c0_6 = arith.constant 0 : index
    %c0_7 = arith.constant 0 : index
    %5 = vector.load %arg4[%c0_5, %c0_6, %c0_7] : memref<1x4x128xf32, #tpu.memory_space<vmem>>, vector<1x4x128xf32>
    %6 = vector.shape_cast %5 : vector<1x4x128xf32> to vector<4x128xf32>
    %7 = tpu.iota {dimensions = array<i32: 1>} : vector<1x128xi32>
    %8 = vector.extract_strided_slice %2 {offsets = [0, 127], sizes = [4, 1], strides = [1, 1]} : vector<4x128xf32> to vector<4x1xf32>
    %9 = vector.extract_strided_slice %4 {offsets = [0, 0], sizes = [4, 127], strides = [1, 1]} : vector<4x128xf32> to vector<4x127xf32>
    %10 = tpu.concatenate %8, %9 in 1 : vector<4x1xf32>, vector<4x127xf32> -> vector<4x128xf32>
    %c-1_i32 = arith.constant -1 : i32
    %11 = arith.addi %0, %c-1_i32 : i32
    %12 = vector.broadcast %11 : i32 to vector<1x128xi32>
    %13 = arith.addi %7, %12 : vector<1x128xi32>
    %c0_i32 = arith.constant 0 : i32
    %14 = vector.broadcast %c0_i32 : i32 to vector<1x128xi32>
    %15 = arith.cmpi sge, %13, %14 : vector<1x128xi32>
    %c16_i32 = arith.constant 16 : i32
    %16 = vector.broadcast %c16_i32 : i32 to vector<1x128xi32>
    %17 = arith.cmpi slt, %13, %16 : vector<1x128xi32>
    %18 = arith.andi %15, %17 : vector<1x128xi1>
    %cst = arith.constant 0.000000e+00 : f32
    %19 = vector.shape_cast %18 : vector<1x128xi1> to vector<1x128xi1>
    %20 = vector.broadcast %19 : vector<1x128xi1> to vector<4x128xi1>
    %21 = vector.broadcast %cst : f32 to vector<4x128xf32>
    %22 = arith.select %20, %10, %21 : vector<4x128xi1>, vector<4x128xf32>
    %c0_i32_8 = arith.constant 0 : i32
    %23 = arith.addi %0, %c0_i32_8 : i32
    %24 = vector.broadcast %23 : i32 to vector<1x128xi32>
    %25 = arith.addi %7, %24 : vector<1x128xi32>
    %c0_i32_9 = arith.constant 0 : i32
    %26 = vector.broadcast %c0_i32_9 : i32 to vector<1x128xi32>
    %27 = arith.cmpi sge, %25, %26 : vector<1x128xi32>
    %c16_i32_10 = arith.constant 16 : i32
    %28 = vector.broadcast %c16_i32_10 : i32 to vector<1x128xi32>
    %29 = arith.cmpi slt, %25, %28 : vector<1x128xi32>
    %30 = arith.andi %27, %29 : vector<1x128xi1>
    %cst_11 = arith.constant 0.000000e+00 : f32
    %31 = vector.shape_cast %30 : vector<1x128xi1> to vector<1x128xi1>
    %32 = vector.broadcast %31 : vector<1x128xi1> to vector<4x128xi1>
    %33 = vector.broadcast %cst_11 : f32 to vector<4x128xf32>
    %34 = arith.select %32, %4, %33 : vector<4x128xi1>, vector<4x128xf32>
    %35 = vector.extract_strided_slice %4 {offsets = [0, 1], sizes = [4, 127], strides = [1, 1]} : vector<4x128xf32> to vector<4x127xf32>
    %36 = vector.extract_strided_slice %6 {offsets = [0, 0], sizes = [4, 1], strides = [1, 1]} : vector<4x128xf32> to vector<4x1xf32>
    %37 = tpu.concatenate %35, %36 in 1 : vector<4x127xf32>, vector<4x1xf32> -> vector<4x128xf32>
    %c1_i32 = arith.constant 1 : i32
    %38 = arith.addi %0, %c1_i32 : i32
    %39 = vector.broadcast %38 : i32 to vector<1x128xi32>
    %40 = arith.addi %7, %39 : vector<1x128xi32>
    %c0_i32_12 = arith.constant 0 : i32
    %41 = vector.broadcast %c0_i32_12 : i32 to vector<1x128xi32>
    %42 = arith.cmpi sge, %40, %41 : vector<1x128xi32>
    %c16_i32_13 = arith.constant 16 : i32
    %43 = vector.broadcast %c16_i32_13 : i32 to vector<1x128xi32>
    %44 = arith.cmpi slt, %40, %43 : vector<1x128xi32>
    %45 = arith.andi %42, %44 : vector<1x128xi1>
    %cst_14 = arith.constant 0.000000e+00 : f32
    %46 = vector.shape_cast %45 : vector<1x128xi1> to vector<1x128xi1>
    %47 = vector.broadcast %46 : vector<1x128xi1> to vector<4x128xi1>
    %48 = vector.broadcast %cst_14 : f32 to vector<4x128xf32>
    %49 = arith.select %47, %37, %48 : vector<4x128xi1>, vector<4x128xf32>
    %50 = tpu.concatenate %22, %34, %49 in 0 : vector<4x128xf32>, vector<4x128xf32>, vector<4x128xf32> -> vector<12x128xf32>
    %c0_15 = arith.constant 0 : index
    %c0_16 = arith.constant 0 : index
    %51 = vector.load %arg5[%c0_15, %c0_16] : memref<8x12xf32, #tpu.memory_space<vmem>>, vector<8x12xf32>
    %cst_17 = arith.constant dense<0.000000e+00> : vector<8x128xf32>
    %52 = tpu.matmul %51, %50, %cst_17 {dimension_numbers = #tpu.dot_dimension_numbers<[1], [0], [0], [1], [0, 0, 1, 1], [], []>} : vector<8x12xf32>, vector<12x128xf32>, vector<8x128xf32> -> vector<8x128xf32>
    %c0_18 = arith.constant 0 : index
    %c0_19 = arith.constant 0 : index
    %53 = vector.load %arg6[%c0_18, %c0_19] : memref<8x1xf32, #tpu.memory_space<vmem>>, vector<8x1xf32>
    %54 = vector.broadcast %53 : vector<8x1xf32> to vector<8x128xf32>
    %55 = arith.addf %52, %54 : vector<8x128xf32>
    %cst_20 = arith.constant 0.000000e+00 : f32
    %56 = vector.broadcast %cst_20 : f32 to vector<8x128xf32>
    %57 = arith.maximumf %55, %56 : vector<8x128xf32>
    %c0_21 = arith.constant 0 : index
    %c0_22 = arith.constant 0 : index
    %c0_23 = arith.constant 0 : index
    %58 = vector.load %arg7[%c0_21, %c0_22, %c0_23] : memref<1x8x128xf32, #tpu.memory_space<vmem>>, vector<1x8x128xf32>
    %59 = vector.shape_cast %58 : vector<1x8x128xf32> to vector<8x128xf32>
    %60 = vector.shape_cast %57 : vector<8x128xf32> to vector<1x8x128xf32>
    tpu.vector_store %arg7[%c0_21, %c0_22, %c0_23], %60 {strides = array<i32>} : memref<1x8x128xf32, #tpu.memory_space<vmem>>, vector<1x8x128xf32>,
    return
  }
  func.func @transform_0(%arg0: i32, %arg1: i32) -> (i32, i32, i32) {
    %c1_i32 = arith.constant 1 : i32
    %0 = arith.muli %arg1, %c1_i32 : i32
    %c1_i32_0 = arith.constant 1 : i32
    %1 = arith.subi %0, %c1_i32_0 : i32
    %c0_i32 = arith.constant 0 : i32
    %2 = arith.maxsi %1, %c0_i32 : i32
    %c0_i32_1 = arith.constant 0 : i32
    %c0_i32_2 = arith.constant 0 : i32
    return %arg0, %c0_i32_1, %2 : i32, i32, i32
  }
  func.func @transform_1(%arg0: i32, %arg1: i32) -> (i32, i32, i32) {
    %c0_i32 = arith.constant 0 : i32
    %c0_i32_0 = arith.constant 0 : i32
    return %arg0, %c0_i32, %arg1 : i32, i32, i32
  }
  func.func @transform_2(%arg0: i32, %arg1: i32) -> (i32, i32, i32) {
    %c1_i32 = arith.constant 1 : i32
    %0 = arith.addi %arg1, %c1_i32 : i32
    %c1_i32_0 = arith.constant 1 : i32
    %1 = arith.muli %0, %c1_i32_0 : i32
    %c0_i32 = arith.constant 0 : i32
    %2 = arith.minsi %1, %c0_i32 : i32
    %c0_i32_1 = arith.constant 0 : i32
    %c0_i32_2 = arith.constant 0 : i32
    return %arg0, %c0_i32_1, %2 : i32, i32, i32
  }
  func.func @transform_3(%arg0: i32, %arg1: i32) -> (i32, i32) {
    %c0_i32 = arith.constant 0 : i32
    %c0_i32_0 = arith.constant 0 : i32
    %c0_i32_1 = arith.constant 0 : i32
    return %c0_i32, %c0_i32_0 : i32, i32
  }
  func.func @transform_4(%arg0: i32, %arg1: i32) -> (i32, i32) {
    %c0_i32 = arith.constant 0 : i32
    %c0_i32_0 = arith.constant 0 : i32
    %c0_i32_1 = arith.constant 0 : i32
    return %c0_i32, %c0_i32_0 : i32, i32
  }
  func.func @transform_5(%arg0: i32, %arg1: i32) -> (i32, i32, i32) {
    %c0_i32 = arith.constant 0 : i32
    %c0_i32_0 = arith.constant 0 : i32
    return %arg0, %c0_i32, %arg1 : i32, i32, i32
  }
}

</mosaic_0001>

<bundles_post_ra>
// kernel: tpu_custom_call.1
= control target key start
LH: loop header
LB: loop body
LE: loop exit
PB: predicated region body
PF: predicated region fallthrough
CT: control target
= control target key end

     0   :  { %s1101_s0 = inlined_call_operand.vmem [shape: f32[2,4,16], index: 0, kind: input, shape index: {}]   ;;  %s1102_s1 = inlined_call_operand.hbm [shape: f32[2,4,16], index: 1, kind: input, shape index: {}]   ;;  %s1103_s2 = inlined_call_operand.hbm [shape: f32[2,4,16], index: 2, kind: input, shape index: {}]   ;;  %s1104_s3 = inlined_call_operand.hbm [shape: f32[8,12], index: 3, kind: input, shape index: {}]   ;;  %s1105_s4 = inlined_call_operand.vmem [shape: f32[8,1], index: 4, kind: input, shape index: {}]   ;;  %s1106_s5 = inlined_call_operand.hbm [shape: f32[2,8,16], index: 5, kind: output, shape index: {}]  }
   0x1   :  { %1111 = sst [smem:[#allocation18_spill]] %s1104_s3 }
   0x2   :  { %10 = vsyncpa [#allocation3], 0 }
   0x3   :  { %12 = vsyncpa [#allocation3 + $0x1], 0 }
   0x4   :  { %13 = vsyncpa [#allocation6], 0 }
   0x5   :  { %15 = vsyncpa [#allocation6 + $0x1], 0 }
   0x6   :  { %16 = vsyncpa [#allocation4], 0 }
   0x7   :  { %18 = vsyncpa [#allocation4 + $0x1], 0  ;;  %s938_s18 = smov 0   ;;  %s940_s19 = smov 0  }
   0x8   :  { %s942_s20 = smov 0   ;;  %s944_s21 = smov 0  }
   0x9   :  { %s946_s22 = smov 0   ;;  %s948_s23 = smov 0  }
   0xa LB: > { %1112 = sst [smem:[#allocation13_spill]] %s882_s18  ;;  %s969_s24 = sadd.s32 4294967295, %s902_s23   ;;  %s902_s23 = sphi %s948_s23, %s24_s23   ;;  %s898_s22 = sphi %s946_s22, %s1127_s22   ;;  %s894_s21 = sphi %s944_s21, %s1126_s21   ;;  %s890_s20 = sphi %s942_s20, %s1130_s20   ;;  %s886_s19 = sphi %s940_s19, %s1129_s19   ;;  %s882_s18 = sphi %s938_s18, %s1128_s18  }
   0xb   : > { %1113 = sst [smem:[#allocation14_spill]] %s898_s22  ;;  %s614_s25 = sadd.s32 4294967294, %s902_s23  }
   0xc   : > { %p92_p0 = scmp.ne.s32.totalorder %s886_s19, %s882_s18  ;;  %p93_p1 = scmp.eq.s32.totalorder %s969_s24, 0 }
   0xd   : > { %p194_p2 = scmp.eq.s32.totalorder %s969_s24, 1  ;;  %p200_p3 = scmp.eq.s32.totalorder %s614_s25, 1 }
   0xe   : > { %p978_p4 = por %p93_p1, %p92_p0  ;;  %p615_p5 = scmp.ge.s32.totalorder %s902_s23, 1 }
   0xf   : > { %p983_p6 = por %p200_p3, %p92_p0  ;;  %p207_p7 = scmp.lt.s32.totalorder %s902_s23, 3 }
  0x10   : > { %s1117_s3 = sld [smem:[#allocation18_spill]]  ;;  %p617_p9 = scmp.ge.s32.totalorder %s902_s23, 2 }
  0x11   : > { %s1115_s27 = scalar_select %p983_p6, 1, 0 }
  0x12   : > { %p991_p8 = pnand %p615_p5, %p207_p7  ;;  %s904_s7 = smov [#allocation7]  }
  0x13   : > { %1116 = sst [smem:[#allocation15_spill]] %s1115_s27  ;;  %s221_s8 = sshll.u32 %s904_s7, 4  ;;  %s222_s8 = int_to_ptr.vmem [resolvable:$true] %s221_s8 }
  0x14   : > { %p644_p10 = pneg %p991_p8  ;;  %s36_s9 = sadd.s32 1, %s898_s22 }
  0x15   : > { %p38_p12 = scmp.ge.s32.totalorder %s36_s9, 2  ;;  %s79_s10 = sadd.s32 1, %s890_s20 }
  0x16   : > { %s219_s30 = sshll.u32 %s1117_s3, 4  ;;  %p645_p11 = pnand %p644_p10, %p93_p1  ;;  %s220_s30 = int_to_ptr.hbm [resolvable:$true] %s219_s30 }
  0x17   : > { %p86_p13 = scmp.ne.s32.totalorder %s890_s20, %s886_s19  ;;  %p87_p0 = scmp.eq.s32.totalorder %s902_s23, 0 }
  0x18   : > { %647 = dma.hbm_to_vmem [thread:$0]  (!%p645_p11), %s220_s30, 128, %s222_s8, [#allocation6]  }
  0x19   : > { %s1132_s9 = smov (%p38_p12, %s36_s9), 0  ;;  %p1007_p3 = por %p87_p0, %p86_p13 }
  0x1a   : > { %1119 = sst [smem:[#allocation16_spill]] %s1132_s9  ;;  %p1013_p5 = por %p194_p2, %p86_p13 }
  0x1b   : > { %s74_s13 = ssub.s32 %s898_s22, %s1132_s9  ;;  %p660_p7 = scmp.lt.s32.totalorder %s902_s23, 2 }
  0x1c   : > { %p77_p10 = scmp.eq.s32.totalorder %s74_s13, 0  ;;  %s251_s14 = sand.u32 1, %s890_s20  }
  0x1d   : > { %s618_s15 = sshll.u32 %s251_s14, 2  ;;  %s619_s17 = sshll.u32 %s898_s22, 2 }
  0x1e   : > { %s1022_s16 = scalar_select %p77_p10, %s890_s20, %s79_s10  }
  0x1f   : > { %s260_s29 = scalar_lea.hbm %s1102_s1, %s619_s17  ;;  %s255_s30 = scalar_lea.vmem [#allocation2], %s618_s15 }
  0x20   : > { %1122 = sst [smem:[#allocation17_spill]] %s1022_s16  ;;  %s264_s7 = sshll.u32 %s255_s30, 4  ;;  %s265_s7 = int_to_ptr.vmem [resolvable:$true] %s264_s7 }
  0x21   : > { %s262_s8 = sshll.u32 %s260_s29, 4  ;;  %p649_p2 = pnand %p660_p7, %p1007_p3  ;;  %s263_s8 = int_to_ptr.hbm [resolvable:$true] %s262_s8 }
  0x22   : > { %s283_s13 = scalar_lea.hbm %s1103_s2, %s619_s17  ;;  %s271_s27 = sand.u32 1, %s902_s23  }
  0x23   : > { %s252_s18 = scalar_lea.sflag [#allocation3], %s251_s14  ;;  %s285_s10 = sshll.u32 %s283_s13, 4  ;;  %s286_s10 = int_to_ptr.hbm [resolvable:$true] %s285_s10 }
  0x24   : > { %651 = dma.hbm_to_vmem [thread:$0]  (!%p649_p2), %s263_s8, 64, %s265_s7, %s252_s18  }
  0x25   : > { %s275_s22 = scalar_lea.vmem [#allocation5], %s618_s15  ;;  %s272_s25 = scalar_lea.sflag [#allocation6], %s271_s27 }
  0x26   : > { %s287_s16 = sshll.u32 %s275_s22, 4  ;;  %296 = sbr.rel (%p991_p8) target bundleno = 312 (0x138), region = 40  ;;  %s288_s16 = int_to_ptr.vmem [resolvable:$true] %s287_s16 }
  0x27   : > { %654 = dma.hbm_to_vmem [thread:$0]  (!%p649_p2), %s286_s10, 64, %s288_s16, %s272_s25  }
  0x28   : > { %s1037_s11 = sand.u32 (!%p991_p8), 1, %s886_s19  }
  0x29   : > { %s623_s3 = sshll.u32 (!%p991_p8), %s1037_s11, 2  ;;  %s299_s9 = scalar_lea.sflag (!%p991_p8), [#allocation3], %s1037_s11 }
  0x2a   : > { %s302_s14 = scalar_lea.vmem (!%p991_p8), [#allocation2], %s623_s3 }
  0x2b   : > { %865 = dma.done.wait (%p978_p4), %s299_s9, 64  }
  0x2c   : > { %867 = vsyncadd (%p978_p4), %s299_s9, 4294967232  ;;  %s308_s18 = sand.u32 1, %s969_s24   ;;  %s312_s27 = scalar_lea.vmem [#allocation5], %s623_s3 }
  0x2d   : > { %s309_s22 = scalar_lea.sflag [#allocation6], %s308_s18 }
  0x2e   : > { %869 = dma.done.wait (%p978_p4), %s309_s22, 64  }
  0x2f   : > { %871 = vsyncadd (%p978_p4), %s309_s22, 4294967232 }
  0x30   : > { %873 = dma.done.wait (%p93_p1), [#allocation6], 128  }
  0x31   : > { %875 = vsyncadd (%p93_p1), [#allocation6], 4294967168  ;;  %p363_p8 = scmp.lt.s32.totalorder %s894_s21, 1  ;;  %v378_v0 = vld [vmem:[%s302_s14] sm:$0xf]  ;;  %s905_s29 = smov 127   ;;  %v380_v6 = vlaneseq }
  0x32   : > { %409 = vrot.lane.b32.xlu0 %v378_v0, %s905_s29  ;;  %s906_s26 = smov 1   ;;  %v379_v3 = vld [vmem:[%s312_s27] sm:$0xf]  ;;  %v433_v4 = vld [vmem:[%s1105_s4] sm:$0xff]  ;;  %v907_v5 = vmov 0   ;;  %vm390_vm3 = vcmask 7168  }
  0x33   : > { %s364_s6 = scalar_select %p363_p8, %s894_s21, 1  ;;  %720 = vset.pattern.permute.xlu1 %v907_v5  ;;  %721 = vset.pattern.permute.xlu0 %v907_v5  ;;  %v381_v7 = vand.u32 127, %v380_v6  ;;  %vm416_vm5 = vcmask 1039360   ;;  %vm430_vm7 = vcmask 1043456   ;;  %v432_v22 = vld [vmem:[#allocation7] sm:$0xff]  ;;  %vm439_vm8 = vcmask 97280  }
  0x34   : > { %s626_s7 = sshll.u32 %s1037_s11, 3  ;;  %s631_s8 = sshll.u32 %s894_s21, 3 }
  0x35   : > { %s627_s15 = sshll.u32 %s364_s6, 2  ;;  %v394_v8 = vadd.s32 4294967295, %v381_v7  ;;  %vm404_vm0 = vcmp.lt.s32.totalorder %v381_v7, 16  ;;  %v420_v14 = vadd.s32 1, %v381_v7  ;;  %s480_s25 = scalar_lea.hbm %s1106_s5, %s631_s8 }
  0x36   : > { %s369_s28 = scalar_lea.vmem %s1101_s0, %s627_s15  ;;  %v408_v11 = vsel %vm404_vm0, %v378_v0, 0.0  ;;  %s359_s3 = scalar_lea.vmem [#allocation8], %s626_s7 }
  0x37   : > { %v377_v1 = vld [vmem:[%s369_s28] sm:$0xf]  ;;  %vm395_vm1 = vcmp.ge.s32.totalorder %v394_v8, 0  ;;  %vm396_vm2 = vcmp.lt.s32.totalorder %v394_v8, 16  ;;  %v428_v16 = vrot.slane %v408_v11, 4  ;;  %vm422_vm6 = vcmp.lt.s32.totalorder %v420_v14, 16 }
  0x38   : > { %v715_v2 = vpack.i.bf16 %v378_v0, %v377_v1  ;;  %vm397_vm4 = vmand %vm395_vm1, %vm396_vm2  ;;  %s482_s9 = sshll.u32 %s359_s3, 4  ;;  %s484_s14 = sshll.u32 %s480_s25, 4  ;;  %s483_s9 = int_to_ptr.vmem [resolvable:$true] %s482_s9  ;;  %s485_s14 = int_to_ptr.hbm [resolvable:$true] %s484_s14 }
  0x39   : > { %s469_s18 = scalar_lea.sflag [#allocation4], %s1037_s11  ;;  %s826_s22 = sshra.s32 %s485_s14, 4  ;;  %s827_s22 = int_to_ptr.hbm [resolvable:$true] %s826_s22 }
  0x3a   : > { %716 = vrot.lane.b32.xlu1 %v715_v2, %s906_s26  ;;  %413 = vrot.lane.b32.xlu0 %v379_v3, %s905_s29  ;;  %s828_s27 = scalar_lea.hbm %s827_s22, 8  ;;  %s832_s15 = scalar_lea.hbm %s1106_s5, 16 }
  0x3b   : > { %p829_p1 = scmp.ne.s32.totalorder %s827_s22, %s828_s27  ;;  %p833_p12 = scmp.lt.s32.totalorder %s827_s22, %s1106_s5 }
  0x3c   : > { %p834_p13 = scmp.lt.s32.totalorder %s832_s15, %s828_s27 }
  0x3d   : > { %p830_p4 = pnand %p829_p1, %p1013_p5 }
  0x3e   : > { %p835_p0 = por %p834_p13, %p833_p12 }
  0x3f   : > { %p831_p11 = pneg %p830_p4 }
  0x41   : > { %p836_p3 = pnand %p835_p0, %p831_p11 }
  0x42   : > { %436 = vperm.xlu1 %720, %v433_v4  }
  0xa4   : > { %v410_v9 = vpop.permute.xlu0 %409 }
  0xac   : > { %v717_v10 = vpop.permute.xlu1 %716  ;;  %v414_v18 = vpop.permute.xlu0 %413 }
  0xad   : > { %v719_v12 = vunpack.i.h.bf16 %v717_v10  ;;  %v718_v13 = vunpack.i.l.bf16 %v717_v10  ;;  %v417_v19 = vsel %vm416_vm5, %v410_v9, %v414_v18 }
  0xae   : > { %v426_v20 = vsel %vm422_vm6, %v417_v19, 0.0 }
  0xaf   : > { %v391_v15 = vsel %vm390_vm3, %v718_v13, %v719_v12  ;;  %628 = vmatpush.msk.msra.mxu0 %vm430_vm7, %v426_v20 }
  0xb0   : > { %v400_v17 = vsel %vm397_vm4, %v391_v15, 0.0 }
  0xb1   : > { %v431_v21 = vsel %vm430_vm7, %v400_v17, %v428_v16 }
  0xb2   : > { %461 = vmatpush.msra.mxu0 %v431_v21 }
  0xb3   : > { %629 = vmatmul.msk.f32.vlgmr.msra.gmra.mxu0 %vm439_vm8, %v432_v22 }
  0xb4   : > { %v437_v23 = vpop.permute.xlu1 %436 }
 0x130   : > { %v463_v24 = vpop.f32.mrf.mxu0 }
 0x131   : > { %v464_v25 = vadd.f32 %v463_v24, %v437_v23 }
 0x133   : > { %v466_v26 = vmax.f32 %v464_v25, 0.0 }
 0x135   : > { %467 = vst [vmem:[%s359_s3] sm:$0xff] %v466_v26 }
 0x136   : > { %839 = shalt.err (!%p836_p3)
}
 0x137   : > { %642 = dma.vmem_to_hbm [thread:$0]  (%p1013_p5), %s483_s9, 128, %s485_s14, %s469_s18  }
 0x138 PF: > { %s1123_s11 = sld [smem:[#allocation13_spill]]  ;;  %p656_p7 = pnand %p617_p9, %p983_p6 }
 0x13a   : > { %p657_p10 = pneg %p656_p7 }
 0x13e   : > { %s496_s29 = sand.u32 1, %s1123_s11  }
 0x13f   : > { %s497_s26 = scalar_lea.sflag [#allocation4], %s496_s29 }
 0x140   : > { %877 = dma.done.wait (%p657_p10), %s497_s26, 128  }
 0x141   : > { %879 = vsyncadd (%p657_p10), %s497_s26, 4294967168  ;;  %s24_s23 = sadd.s32 1, %s902_s23   ;;  %s1125_s24 = sld [smem:[#allocation17_spill]] }
 0x142   : > { %p21_p2 = scmp.ge.s32.totalorder %s24_s23, 4   ;;  %s1126_s21 = sld [smem:[#allocation14_spill]] }
 0x143   : > { %s1127_s22 = sld [smem:[#allocation16_spill]]  ;;  %s1128_s18 = smov %s886_s19 }
 0x144   : > { %s1129_s19 = smov %s890_s20  ;;  %23 = sbr.rel (!%p21_p2) target bundleno = 10 (0xa), region = 105 }
 0x147   : > { %s1130_s20 = smov %s1125_s24 }
 0x149   :  { %503 = vsyncpa [#allocation3], 1 }
 0x14a   :  { %505 = vsyncpa [#allocation3 + $0x1], 1 }
 0x14b   :  { %506 = vsyncpa [#allocation6], 1 }
 0x14c   :  { %508 = vsyncpa [#allocation6 + $0x1], 1 }
 0x14d   :  { %509 = vsyncpa [#allocation4], 1 }
 0x14e   :  { %511 = vsyncpa [#allocation4 + $0x1], 1 }

</bundles_post_ra>
